<compile_context>
chip_gen: v5e
topology: v5e:2x2
jax: 0.10.0
libtpu: 0.0.40
codegen_flags: <defaults>
</compile_context>

<pallas_src>
import functools

import jax
import jax.numpy as jnp
from jax.experimental import pallas as pl
from jax.experimental.pallas import tpu as pltpu

_LANE = 128
_MAX_TILE_ROWS = 256  # 256 rows x 128 lanes x 3ch x 4B ~= 384 KiB / input buffer


def _color_jitter_kernel(params_ref, img_ref, out_ref, *,
                         gray_in, do_affine, do_sat, do_hue):
    """One grid step = one (sample, row-tile) block.

    params_ref: (B*8,) f32 in SMEM; per sample:
                [a, b0, sf, 1-sf, hf, 0, 0, 0] with a = bf*cf and
                b0 = bf*gray_mean*(1-cf) folded in the wrapper.
    img_ref:    (1, C_in,  TILE_ROWS, 128) block in VMEM (C_in = 1 or 3)
    out_ref:    (1, C_out, TILE_ROWS, 128) block in VMEM (C_out = 1 or 3)
    """
    b = pl.program_id(0)
    base = b * 8
    a = params_ref[base + 0]      # folded brightness*contrast gain
    b0 = params_ref[base + 1]     # folded offset (towards gray mean)
    sf = params_ref[base + 2]     # saturation factor
    sf1 = params_ref[base + 3]    # 1 - saturation factor
    hf = params_ref[base + 4]     # hue shift (in turns, [-0.5, 0.5])

    if gray_in:
        x = img_ref[0, 0].astype(jnp.float32)       # (TILE_ROWS, 128)
        r = g = bl = x
    else:
        r = img_ref[0, 0].astype(jnp.float32)
        g = img_ref[0, 1].astype(jnp.float32)
        bl = img_ref[0, 2].astype(jnp.float32)

    # 1+2) brightness & contrast folded into one affine per channel:
    #      y = cf*(bf*x - bf*gm) + bf*gm = a*x + b0
    if do_affine:
        r = r * a + b0
        g = g * a + b0
        bl = bl * a + b0

    # 3) saturation: blend towards the per-pixel grayscale value.
    #    (Skipped statically for gray inputs: identity on equal channels.)
    if do_sat:
        gray = (0.299 * r + 0.587 * g + 0.114 * bl) * sf1
        r = r * sf + gray
        g = g * sf + gray
        bl = bl * sf + gray

    # 4) hue: remap [-1,1] -> [0,1], RGB -> HSV, shift hue, k-formula HSV ->
    #    RGB, remap back.  (Skipped statically when hue == 0 or gray input.)
    if do_hue:
        eps = 1e-6
        r01 = (r + 1.0) * 0.5
        g01 = (g + 1.0) * 0.5
        b01 = (bl + 1.0) * 0.5
        maxc = jnp.maximum(jnp.maximum(r01, g01), b01)
        minc = jnp.minimum(jnp.minimum(r01, g01), b01)
        v = maxc
        delta = maxc - minc
        # approx EUP reciprocal is fine for the saturation denominator
        s = delta * pl.reciprocal(maxc + eps, approx=True)
        has_c = delta > eps
        inv_d = 1.0 / jnp.where(has_c, delta, 1.0)   # exact for hue numerators
        rc = (maxc - r01) * inv_d
        gc = (maxc - g01) * inv_d
        bc = (maxc - b01) * inv_d
        h = jnp.where(maxc == r01, bc - gc,
                      jnp.where(maxc == g01, 2.0 + rc - bc, 4.0 + gc - rc))
        h = jnp.where(has_c, (h * (1.0 / 6.0)) % 1.0, 0.0)
        h6 = ((h + hf) % 1.0) * 6.0

        vs = v * s
        kr = (h6 + 5.0) % 6.0
        kg = (h6 + 3.0) % 6.0
        kb = (h6 + 1.0) % 6.0
        fr = jnp.clip(jnp.minimum(kr, 4.0 - kr), 0.0, 1.0)
        fg = jnp.clip(jnp.minimum(kg, 4.0 - kg), 0.0, 1.0)
        fb = jnp.clip(jnp.minimum(kb, 4.0 - kb), 0.0, 1.0)
        r = (v - vs * fr) * 2.0 - 1.0
        g = (v - vs * fg) * 2.0 - 1.0
        bl = (v - vs * fb) * 2.0 - 1.0

    # TODO(synk): on v5e, strip-mining the hue chain over (8..32, 128) sub-rows
    # would further reduce spill stores; left to the Mosaic scheduler here.

    if gray_in:
        # channels stay identical (sat/hue are identity on equal channels), so
        # mean-over-3 == the single channel.
        out_ref[0, 0] = jnp.clip(r, -1.0, 1.0).astype(out_ref.dtype)
    else:
        out_ref[0, 0] = jnp.clip(r, -1.0, 1.0).astype(out_ref.dtype)
        out_ref[0, 1] = jnp.clip(g, -1.0, 1.0).astype(out_ref.dtype)
        out_ref[0, 2] = jnp.clip(bl, -1.0, 1.0).astype(out_ref.dtype)


def _color_jitter(x, params, *, gray_in, do_affine, do_sat, do_hue):
    """x: (B, C, H, W) with C in {1, 3}; params: (B*8,) f32 scalar table."""
    B, C, H, W = x.shape
    HW = H * W
    hw_pad = ((HW + _LANE - 1) // _LANE) * _LANE

    x_flat = x.reshape(B, C, HW)
    if hw_pad != HW:
        # only pads when H*W is not a multiple of 128
        x_flat = jnp.pad(x_flat, ((0, 0), (0, 0), (0, hw_pad - HW)))
    rows = hw_pad // _LANE
    x4 = x_flat.reshape(B, C, rows, _LANE)

    # sublane-dense row tile: full extent if small, else a multiple-of-8 tile.
    tile_rows = rows if rows <= _MAX_TILE_ROWS else _MAX_TILE_ROWS
    n_tiles = pl.cdiv(rows, tile_rows)

    c_out = 1 if gray_in else 3
    out4 = pl.pallas_call(
        functools.partial(_color_jitter_kernel, gray_in=gray_in,
                          do_affine=do_affine, do_sat=do_sat, do_hue=do_hue),
        out_shape=jax.ShapeDtypeStruct((B, c_out, rows, _LANE), x.dtype),
        grid_spec=pltpu.PrefetchScalarGridSpec(
            num_scalar_prefetch=0,
            grid=(B, n_tiles),
            in_specs=[
                # flat per-sample scalar table lives in SMEM
                pl.BlockSpec(memory_space=pltpu.MemorySpace.SMEM),
                pl.BlockSpec((1, C, tile_rows, _LANE),
                             lambda b, t: (b, 0, t, 0)),
            ],
            out_specs=pl.BlockSpec((1, c_out, tile_rows, _LANE),
                                   lambda b, t: (b, 0, t, 0)),
        ),
        compiler_params=pltpu.CompilerParams(
            dimension_semantics=("parallel", "parallel")),
    )(params, x4)

    out_flat = out4.reshape(B, c_out, hw_pad)
    if hw_pad != HW:
        out_flat = out_flat[:, :, :HW]
    return out_flat.reshape(B, c_out, H, W)


class DiffColor:
    """JAX/Pallas port of the PyTorch DiffColor noise layer.

    forward: (expand 1ch->3ch), ColorJitter(b, c, s, h), (mean back to 1ch),
    clamp to [-1, 1].  The 1ch expansion / mean-back never touches HBM: it is
    folded into the kernel (equal channels make saturation/hue identity).
    """

    def __init__(self, b, c, s, h):
        self.brightness = float(b)
        self.contrast = float(c)
        self.saturation = float(s)
        self.hue = float(h)

    def _sample_params(self, key, x, gray_in):
        # TODO(synk): factors follow the standard ColorJitter uniform ranges,
        # sampled per-sample with jax.random (not torch's exact RNG stream).
        B = x.shape[0]
        k1, k2, k3, k4 = jax.random.split(key, 4)

        def _factor(k, amount):
            if amount <= 0.0:
                return jnp.ones((B,), jnp.float32)
            lo = max(0.0, 1.0 - amount)
            hi = 1.0 + amount
            return jax.random.uniform(k, (B,), jnp.float32, lo, hi)

        bf = _factor(k1, self.brightness)
        cf = _factor(k2, self.contrast)
        sf = _factor(k3, self.saturation)
        if self.hue > 0.0:
            hf = jax.random.uniform(k4, (B,), jnp.float32, -self.hue, self.hue)
        else:
            hf = jnp.zeros((B,), jnp.float32)

        # per-sample grayscale mean only when contrast is active (skips a full
        # HBM read pass otherwise); for gray inputs read the single channel.
        if self.contrast > 0.0:
            xf = x.astype(jnp.float32)
            if gray_in:
                gm = jnp.mean(xf[:, 0], axis=(1, 2))
            else:
                gm = jnp.mean(0.299 * xf[:, 0] + 0.587 * xf[:, 1]
                              + 0.114 * xf[:, 2], axis=(1, 2))
        else:
            gm = jnp.zeros((B,), jnp.float32)

        # fold brightness+contrast into a single per-sample affine:
        #   y = cf*(bf*x - m) + m  with  m = bf*gm   ->   y = a*x + b0
        a = bf * cf
        b0 = bf * gm * (1.0 - cf)
        z = jnp.zeros((B,), jnp.float32)
        params = jnp.stack([a, b0, sf, 1.0 - sf, hf, z, z, z], axis=1)  # (B,8)
        return params.reshape(-1)                                       # (B*8,)

    def __call__(self, x, key):
        B, C, H, W = x.shape
        gray_in = (C == 1)
        assert gray_in or C == 3, "DiffColor expects 1- or 3-channel images"

        params = self._sample_params(key, x, gray_in)
        do_affine = (self.brightness > 0.0) or (self.contrast > 0.0)
        # saturation / hue are mathematically identity for equal channels, so
        # they are compiled out for grayscale inputs.
        do_sat = (self.saturation > 0.0) and not gray_in
        do_hue = (self.hue > 0.0) and not gray_in
        return _color_jitter(x, params, gray_in=gray_in, do_affine=do_affine,
                             do_sat=do_sat, do_hue=do_hue)


if __name__ == "__main__":
    key = jax.random.PRNGKey(0)
    kx, kaug = jax.random.split(key)

    B, C, H, W = 2, 3, 16, 16
    x = jax.random.uniform(kx, (B, C, H, W), jnp.float32, -1.0, 1.0)

    layer = DiffColor(0.3, 0.3, 0.3, 0.1)
    y = jax.block_until_ready(layer(x, kaug))
    assert y.shape == (B, 3, H, W) and y.dtype == x.dtype
    assert bool(jnp.all(jnp.isfinite(y)))
    assert bool(jnp.all(y <= 1.0)) and bool(jnp.all(y >= -1.0))

    # hue/saturation disabled -> specialized variant skips the HSV round trip
    layer_bc = DiffColor(0.3, 0.3, 0.0, 0.0)
    y2 = jax.block_until_ready(layer_bc(x, kaug))
    assert y2.shape == (B, 3, H, W) and y2.dtype == x.dtype
    assert bool(jnp.all(jnp.isfinite(y2)))
    assert bool(jnp.all(y2 <= 1.0)) and bool(jnp.all(y2 >= -1.0))

    # grayscale branch: (expand to 3ch ->) jitter -> mean back to 1ch -> clamp
    xg = jnp.mean(x, axis=1, keepdims=True)
    yg = jax.block_until_ready(layer(xg, kaug))
    assert yg.shape == (B, 1, H, W) and yg.dtype == x.dtype
    assert bool(jnp.all(jnp.isfinite(yg)))
    assert bool(jnp.all(yg <= 1.0)) and bool(jnp.all(yg >= -1.0))

    print("KERNEL_OK")
</pallas_src>

<mosaic_0001>
module attributes {stable_mosaic.version = 11 : i64} {
  func.func @_color_jitter_kernel(%arg0: i32, %arg1: i32, %arg2: memref<16xf32, #tpu.memory_space<smem>>, %arg3: memref<1x3x2x128xf32, #tpu.memory_space<vmem>>, %arg4: memref<1x3x2x128xf32, #tpu.memory_space<vmem>>) attributes {dimension_semantics = [#tpu.dimension_semantics<parallel>, #tpu.dimension_semantics<parallel>], iteration_bounds = array<i64: 2, 1>, scalar_prefetch = 0 : i64, scratch_operands = 0 : i64, tpu.core_type = #tpu.core_type<tc>, window_params = [{transform_indices = @transform_0, window_bounds = array<i64: 16>}, {transform_indices = @transform_1, window_bounds = array<i64: 1, 3, 2, 128>}, {transform_indices = @transform_2, window_bounds = array<i64: 1, 3, 2, 128>}]} {
    %c8_i32 = arith.constant 8 : i32
    %0 = arith.muli %arg0, %c8_i32 : i32
    %c0_i32 = arith.constant 0 : i32
    %1 = arith.addi %0, %c0_i32 : i32
    %2 = arith.index_cast %1 : i32 to index
    %3 = memref.load %arg2[%2] : memref<16xf32, #tpu.memory_space<smem>>
    %c1_i32 = arith.constant 1 : i32
    %4 = arith.addi %0, %c1_i32 : i32
    %5 = arith.index_cast %4 : i32 to index
    %6 = memref.load %arg2[%5] : memref<16xf32, #tpu.memory_space<smem>>
    %c2_i32 = arith.constant 2 : i32
    %7 = arith.addi %0, %c2_i32 : i32
    %8 = arith.index_cast %7 : i32 to index
    %9 = memref.load %arg2[%8] : memref<16xf32, #tpu.memory_space<smem>>
    %c3_i32 = arith.constant 3 : i32
    %10 = arith.addi %0, %c3_i32 : i32
    %11 = arith.index_cast %10 : i32 to index
    %12 = memref.load %arg2[%11] : memref<16xf32, #tpu.memory_space<smem>>
    %c4_i32 = arith.constant 4 : i32
    %13 = arith.addi %0, %c4_i32 : i32
    %14 = arith.index_cast %13 : i32 to index
    %15 = memref.load %arg2[%14] : memref<16xf32, #tpu.memory_space<smem>>
    %c0 = arith.constant 0 : index
    %c0_0 = arith.constant 0 : index
    %c0_1 = arith.constant 0 : index
    %c0_2 = arith.constant 0 : index
    %16 = vector.load %arg3[%c0, %c0_0, %c0_1, %c0_2] : memref<1x3x2x128xf32, #tpu.memory_space<vmem>>, vector<1x1x2x128xf32>
    %17 = vector.shape_cast %16 : vector<1x1x2x128xf32> to vector<2x128xf32>
    %c0_3 = arith.constant 0 : index
    %c1 = arith.constant 1 : index
    %c0_4 = arith.constant 0 : index
    %c0_5 = arith.constant 0 : index
    %18 = vector.load %arg3[%c0_3, %c1, %c0_4, %c0_5] : memref<1x3x2x128xf32, #tpu.memory_space<vmem>>, vector<1x1x2x128xf32>
    %19 = vector.shape_cast %18 : vector<1x1x2x128xf32> to vector<2x128xf32>
    %c0_6 = arith.constant 0 : index
    %c2 = arith.constant 2 : index
    %c0_7 = arith.constant 0 : index
    %c0_8 = arith.constant 0 : index
    %20 = vector.load %arg3[%c0_6, %c2, %c0_7, %c0_8] : memref<1x3x2x128xf32, #tpu.memory_space<vmem>>, vector<1x1x2x128xf32>
    %21 = vector.shape_cast %20 : vector<1x1x2x128xf32> to vector<2x128xf32>
    %22 = vector.broadcast %3 : f32 to vector<2x128xf32>
    %23 = arith.mulf %17, %22 : vector<2x128xf32>
    %24 = vector.broadcast %6 : f32 to vector<2x128xf32>
    %25 = arith.addf %23, %24 : vector<2x128xf32>
    %26 = vector.broadcast %3 : f32 to vector<2x128xf32>
    %27 = arith.mulf %19, %26 : vector<2x128xf32>
    %28 = vector.broadcast %6 : f32 to vector<2x128xf32>
    %29 = arith.addf %27, %28 : vector<2x128xf32>
    %30 = vector.broadcast %3 : f32 to vector<2x128xf32>
    %31 = arith.mulf %21, %30 : vector<2x128xf32>
    %32 = vector.broadcast %6 : f32 to vector<2x128xf32>
    %33 = arith.addf %31, %32 : vector<2x128xf32>
    %cst = arith.constant 2.990000e-01 : f32
    %34 = vector.broadcast %cst : f32 to vector<2x128xf32>
    %35 = arith.mulf %34, %25 : vector<2x128xf32>
    %cst_9 = arith.constant 5.870000e-01 : f32
    %36 = vector.broadcast %cst_9 : f32 to vector<2x128xf32>
    %37 = arith.mulf %36, %29 : vector<2x128xf32>
    %38 = arith.addf %35, %37 : vector<2x128xf32>
    %cst_10 = arith.constant 1.140000e-01 : f32
    %39 = vector.broadcast %cst_10 : f32 to vector<2x128xf32>
    %40 = arith.mulf %39, %33 : vector<2x128xf32>
    %41 = arith.addf %38, %40 : vector<2x128xf32>
    %42 = vector.broadcast %12 : f32 to vector<2x128xf32>
    %43 = arith.mulf %41, %42 : vector<2x128xf32>
    %44 = vector.broadcast %9 : f32 to vector<2x128xf32>
    %45 = arith.mulf %25, %44 : vector<2x128xf32>
    %46 = arith.addf %45, %43 : vector<2x128xf32>
    %47 = vector.broadcast %9 : f32 to vector<2x128xf32>
    %48 = arith.mulf %29, %47 : vector<2x128xf32>
    %49 = arith.addf %48, %43 : vector<2x128xf32>
    %50 = vector.broadcast %9 : f32 to vector<2x128xf32>
    %51 = arith.mulf %33, %50 : vector<2x128xf32>
    %52 = arith.addf %51, %43 : vector<2x128xf32>
    %cst_11 = arith.constant 1.000000e+00 : f32
    %53 = vector.broadcast %cst_11 : f32 to vector<2x128xf32>
    %54 = arith.addf %46, %53 : vector<2x128xf32>
    %cst_12 = arith.constant 5.000000e-01 : f32
    %55 = vector.broadcast %cst_12 : f32 to vector<2x128xf32>
    %56 = arith.mulf %54, %55 : vector<2x128xf32>
    %cst_13 = arith.constant 1.000000e+00 : f32
    %57 = vector.broadcast %cst_13 : f32 to vector<2x128xf32>
    %58 = arith.addf %49, %57 : vector<2x128xf32>
    %cst_14 = arith.constant 5.000000e-01 : f32
    %59 = vector.broadcast %cst_14 : f32 to vector<2x128xf32>
    %60 = arith.mulf %58, %59 : vector<2x128xf32>
    %cst_15 = arith.constant 1.000000e+00 : f32
    %61 = vector.broadcast %cst_15 : f32 to vector<2x128xf32>
    %62 = arith.addf %52, %61 : vector<2x128xf32>
    %cst_16 = arith.constant 5.000000e-01 : f32
    %63 = vector.broadcast %cst_16 : f32 to vector<2x128xf32>
    %64 = arith.mulf %62, %63 : vector<2x128xf32>
    %65 = arith.maximumf %56, %60 : vector<2x128xf32>
    %66 = arith.maximumf %65, %64 : vector<2x128xf32>
    %67 = arith.minimumf %56, %60 : vector<2x128xf32>
    %68 = arith.minimumf %67, %64 : vector<2x128xf32>
    %69 = arith.subf %66, %68 : vector<2x128xf32>
    %cst_17 = arith.constant 9.99999997E-7 : f32
    %70 = vector.broadcast %cst_17 : f32 to vector<2x128xf32>
    %71 = arith.addf %66, %70 : vector<2x128xf32>
    %72 = tpu.reciprocal %71 {approx = true} : vector<2x128xf32> -> vector<2x128xf32>
    %73 = arith.mulf %69, %72 : vector<2x128xf32>
    %cst_18 = arith.constant 9.99999997E-7 : f32
    %74 = vector.broadcast %cst_18 : f32 to vector<2x128xf32>
    %75 = arith.cmpf ogt, %69, %74 : vector<2x128xf32>
    %cst_19 = arith.constant 1.000000e+00 : f32
    %76 = vector.broadcast %cst_19 : f32 to vector<2x128xf32>
    %77 = arith.select %75, %69, %76 : vector<2x128xi1>, vector<2x128xf32>
    %cst_20 = arith.constant 1.000000e+00 : f32
    %78 = vector.broadcast %cst_20 : f32 to vector<2x128xf32>
    %79 = arith.divf %78, %77 : vector<2x128xf32>
    %80 = arith.subf %66, %56 : vector<2x128xf32>
    %81 = arith.mulf %80, %79 : vector<2x128xf32>
    %82 = arith.subf %66, %60 : vector<2x128xf32>
    %83 = arith.mulf %82, %79 : vector<2x128xf32>
    %84 = arith.subf %66, %64 : vector<2x128xf32>
    %85 = arith.mulf %84, %79 : vector<2x128xf32>
    %86 = arith.cmpf oeq, %66, %56 : vector<2x128xf32>
    %87 = arith.subf %85, %83 : vector<2x128xf32>
    %88 = arith.cmpf oeq, %66, %60 : vector<2x128xf32>
    %cst_21 = arith.constant 2.000000e+00 : f32
    %89 = vector.broadcast %cst_21 : f32 to vector<2x128xf32>
    %90 = arith.addf %89, %81 : vector<2x128xf32>
    %91 = arith.subf %90, %85 : vector<2x128xf32>
    %cst_22 = arith.constant 4.000000e+00 : f32
    %92 = vector.broadcast %cst_22 : f32 to vector<2x128xf32>
    %93 = arith.addf %92, %83 : vector<2x128xf32>
    %94 = arith.subf %93, %81 : vector<2x128xf32>
    %95 = arith.select %88, %91, %94 : vector<2x128xi1>, vector<2x128xf32>
    %96 = arith.select %86, %87, %95 : vector<2x128xi1>, vector<2x128xf32>
    %cst_23 = arith.constant 0.166666672 : f32
    %97 = vector.broadcast %cst_23 : f32 to vector<2x128xf32>
    %98 = arith.mulf %96, %97 : vector<2x128xf32>
    %cst_24 = arith.constant 1.000000e+00 : f32
    %99 = vector.broadcast %cst_24 : f32 to vector<2x128xf32>
    %100 = arith.remf %98, %99 : vector<2x128xf32>
    %cst_25 = arith.constant 0.000000e+00 : f32
    %101 = vector.broadcast %cst_25 : f32 to vector<2x128xf32>
    %102 = arith.cmpf one, %100, %101 : vector<2x128xf32>
    %cst_26 = arith.constant 0.000000e+00 : f32
    %103 = vector.broadcast %cst_26 : f32 to vector<2x128xf32>
    %104 = arith.cmpf olt, %100, %103 : vector<2x128xf32>
    %cst_27 = arith.constant 0.000000e+00 : f32
    %105 = arith.cmpf olt, %cst_24, %cst_27 : f32
    %106 = vector.broadcast %105 : i1 to vector<2x128xi1>
    %107 = vector.broadcast %106 : vector<2x128xi1> to vector<2x128xi1>
    %108 = arith.xori %104, %107 : vector<2x128xi1>
    %109 = arith.andi %108, %102 : vector<2x128xi1>
    %110 = vector.broadcast %cst_24 : f32 to vector<2x128xf32>
    %111 = arith.addf %100, %110 : vector<2x128xf32>
    %112 = arith.select %109, %111, %100 : vector<2x128xi1>, vector<2x128xf32>
    %cst_28 = arith.constant 0.000000e+00 : f32
    %113 = vector.broadcast %cst_28 : f32 to vector<2x128xf32>
    %114 = arith.select %75, %112, %113 : vector<2x128xi1>, vector<2x128xf32>
    %115 = vector.broadcast %15 : f32 to vector<2x128xf32>
    %116 = arith.addf %114, %115 : vector<2x128xf32>
    %cst_29 = arith.constant 1.000000e+00 : f32
    %117 = vector.broadcast %cst_29 : f32 to vector<2x128xf32>
    %118 = arith.remf %116, %117 : vector<2x128xf32>
    %cst_30 = arith.constant 0.000000e+00 : f32
    %119 = vector.broadcast %cst_30 : f32 to vector<2x128xf32>
    %120 = arith.cmpf one, %118, %119 : vector<2x128xf32>
    %cst_31 = arith.constant 0.000000e+00 : f32
    %121 = vector.broadcast %cst_31 : f32 to vector<2x128xf32>
    %122 = arith.cmpf olt, %118, %121 : vector<2x128xf32>
    %cst_32 = arith.constant 0.000000e+00 : f32
    %123 = arith.cmpf olt, %cst_29, %cst_32 : f32
    %124 = vector.broadcast %123 : i1 to vector<2x128xi1>
    %125 = vector.broadcast %124 : vector<2x128xi1> to vector<2x128xi1>
    %126 = arith.xori %122, %125 : vector<2x128xi1>
    %127 = arith.andi %126, %120 : vector<2x128xi1>
    %128 = vector.broadcast %cst_29 : f32 to vector<2x128xf32>
    %129 = arith.addf %118, %128 : vector<2x128xf32>
    %130 = arith.select %127, %129, %118 : vector<2x128xi1>, vector<2x128xf32>
    %cst_33 = arith.constant 6.000000e+00 : f32
    %131 = vector.broadcast %cst_33 : f32 to vector<2x128xf32>
    %132 = arith.mulf %130, %131 : vector<2x128xf32>
    %133 = arith.mulf %66, %73 : vector<2x128xf32>
    %cst_34 = arith.constant 5.000000e+00 : f32
    %134 = vector.broadcast %cst_34 : f32 to vector<2x128xf32>
    %135 = arith.addf %132, %134 : vector<2x128xf32>
    %cst_35 = arith.constant 6.000000e+00 : f32
    %136 = vector.broadcast %cst_35 : f32 to vector<2x128xf32>
    %137 = arith.remf %135, %136 : vector<2x128xf32>
    %cst_36 = arith.constant 0.000000e+00 : f32
    %138 = vector.broadcast %cst_36 : f32 to vector<2x128xf32>
    %139 = arith.cmpf one, %137, %138 : vector<2x128xf32>
    %cst_37 = arith.constant 0.000000e+00 : f32
    %140 = vector.broadcast %cst_37 : f32 to vector<2x128xf32>
    %141 = arith.cmpf olt, %137, %140 : vector<2x128xf32>
    %cst_38 = arith.constant 0.000000e+00 : f32
    %142 = arith.cmpf olt, %cst_35, %cst_38 : f32
    %143 = vector.broadcast %142 : i1 to vector<2x128xi1>
    %144 = vector.broadcast %143 : vector<2x128xi1> to vector<2x128xi1>
    %145 = arith.xori %141, %144 : vector<2x128xi1>
    %146 = arith.andi %145, %139 : vector<2x128xi1>
    %147 = vector.broadcast %cst_35 : f32 to vector<2x128xf32>
    %148 = arith.addf %137, %147 : vector<2x128xf32>
    %149 = arith.select %146, %148, %137 : vector<2x128xi1>, vector<2x128xf32>
    %cst_39 = arith.constant 3.000000e+00 : f32
    %150 = vector.broadcast %cst_39 : f32 to vector<2x128xf32>
    %151 = arith.addf %132, %150 : vector<2x128xf32>
    %cst_40 = arith.constant 6.000000e+00 : f32
    %152 = vector.broadcast %cst_40 : f32 to vector<2x128xf32>
    %153 = arith.remf %151, %152 : vector<2x128xf32>
    %cst_41 = arith.constant 0.000000e+00 : f32
    %154 = vector.broadcast %cst_41 : f32 to vector<2x128xf32>
    %155 = arith.cmpf one, %153, %154 : vector<2x128xf32>
    %cst_42 = arith.constant 0.000000e+00 : f32
    %156 = vector.broadcast %cst_42 : f32 to vector<2x128xf32>
    %157 = arith.cmpf olt, %153, %156 : vector<2x128xf32>
    %cst_43 = arith.constant 0.000000e+00 : f32
    %158 = arith.cmpf olt, %cst_40, %cst_43 : f32
    %159 = vector.broadcast %158 : i1 to vector<2x128xi1>
    %160 = vector.broadcast %159 : vector<2x128xi1> to vector<2x128xi1>
    %161 = arith.xori %157, %160 : vector<2x128xi1>
    %162 = arith.andi %161, %155 : vector<2x128xi1>
    %163 = vector.broadcast %cst_40 : f32 to vector<2x128xf32>
    %164 = arith.addf %153, %163 : vector<2x128xf32>
    %165 = arith.select %162, %164, %153 : vector<2x128xi1>, vector<2x128xf32>
    %cst_44 = arith.constant 1.000000e+00 : f32
    %166 = vector.broadcast %cst_44 : f32 to vector<2x128xf32>
    %167 = arith.addf %132, %166 : vector<2x128xf32>
    %cst_45 = arith.constant 6.000000e+00 : f32
    %168 = vector.broadcast %cst_45 : f32 to vector<2x128xf32>
    %169 = arith.remf %167, %168 : vector<2x128xf32>
    %cst_46 = arith.constant 0.000000e+00 : f32
    %170 = vector.broadcast %cst_46 : f32 to vector<2x128xf32>
    %171 = arith.cmpf one, %169, %170 : vector<2x128xf32>
    %cst_47 = arith.constant 0.000000e+00 : f32
    %172 = vector.broadcast %cst_47 : f32 to vector<2x128xf32>
    %173 = arith.cmpf olt, %169, %172 : vector<2x128xf32>
    %cst_48 = arith.constant 0.000000e+00 : f32
    %174 = arith.cmpf olt, %cst_45, %cst_48 : f32
    %175 = vector.broadcast %174 : i1 to vector<2x128xi1>
    %176 = vector.broadcast %175 : vector<2x128xi1> to vector<2x128xi1>
    %177 = arith.xori %173, %176 : vector<2x128xi1>
    %178 = arith.andi %177, %171 : vector<2x128xi1>
    %179 = vector.broadcast %cst_45 : f32 to vector<2x128xf32>
    %180 = arith.addf %169, %179 : vector<2x128xf32>
    %181 = arith.select %178, %180, %169 : vector<2x128xi1>, vector<2x128xf32>
    %cst_49 = arith.constant 4.000000e+00 : f32
    %182 = vector.broadcast %cst_49 : f32 to vector<2x128xf32>
    %183 = arith.subf %182, %149 : vector<2x128xf32>
    %184 = arith.minimumf %149, %183 : vector<2x128xf32>
    %cst_50 = arith.constant 0.000000e+00 : f32
    %cst_51 = arith.constant 1.000000e+00 : f32
    %185 = vector.broadcast %cst_50 : f32 to vector<2x128xf32>
    %186 = arith.maximumf %185, %184 : vector<2x128xf32>
    %187 = vector.broadcast %cst_51 : f32 to vector<2x128xf32>
    %188 = arith.minimumf %187, %186 : vector<2x128xf32>
    %cst_52 = arith.constant 4.000000e+00 : f32
    %189 = vector.broadcast %cst_52 : f32 to vector<2x128xf32>
    %190 = arith.subf %189, %165 : vector<2x128xf32>
    %191 = arith.minimumf %165, %190 : vector<2x128xf32>
    %cst_53 = arith.constant 0.000000e+00 : f32
    %cst_54 = arith.constant 1.000000e+00 : f32
    %192 = vector.broadcast %cst_53 : f32 to vector<2x128xf32>
    %193 = arith.maximumf %192, %191 : vector<2x128xf32>
    %194 = vector.broadcast %cst_54 : f32 to vector<2x128xf32>
    %195 = arith.minimumf %194, %193 : vector<2x128xf32>
    %cst_55 = arith.constant 4.000000e+00 : f32
    %196 = vector.broadcast %cst_55 : f32 to vector<2x128xf32>
    %197 = arith.subf %196, %181 : vector<2x128xf32>
    %198 = arith.minimumf %181, %197 : vector<2x128xf32>
    %cst_56 = arith.constant 0.000000e+00 : f32
    %cst_57 = arith.constant 1.000000e+00 : f32
    %199 = vector.broadcast %cst_56 : f32 to vector<2x128xf32>
    %200 = arith.maximumf %199, %198 : vector<2x128xf32>
    %201 = vector.broadcast %cst_57 : f32 to vector<2x128xf32>
    %202 = arith.minimumf %201, %200 : vector<2x128xf32>
    %203 = arith.mulf %133, %188 : vector<2x128xf32>
    %204 = arith.subf %66, %203 : vector<2x128xf32>
    %cst_58 = arith.constant 2.000000e+00 : f32
    %205 = vector.broadcast %cst_58 : f32 to vector<2x128xf32>
    %206 = arith.mulf %204, %205 : vector<2x128xf32>
    %cst_59 = arith.constant 1.000000e+00 : f32
    %207 = vector.broadcast %cst_59 : f32 to vector<2x128xf32>
    %208 = arith.subf %206, %207 : vector<2x128xf32>
    %209 = arith.mulf %133, %195 : vector<2x128xf32>
    %210 = arith.subf %66, %209 : vector<2x128xf32>
    %cst_60 = arith.constant 2.000000e+00 : f32
    %211 = vector.broadcast %cst_60 : f32 to vector<2x128xf32>
    %212 = arith.mulf %210, %211 : vector<2x128xf32>
    %cst_61 = arith.constant 1.000000e+00 : f32
    %213 = vector.broadcast %cst_61 : f32 to vector<2x128xf32>
    %214 = arith.subf %212, %213 : vector<2x128xf32>
    %215 = arith.mulf %133, %202 : vector<2x128xf32>
    %216 = arith.subf %66, %215 : vector<2x128xf32>
    %cst_62 = arith.constant 2.000000e+00 : f32
    %217 = vector.broadcast %cst_62 : f32 to vector<2x128xf32>
    %218 = arith.mulf %216, %217 : vector<2x128xf32>
    %cst_63 = arith.constant 1.000000e+00 : f32
    %219 = vector.broadcast %cst_63 : f32 to vector<2x128xf32>
    %220 = arith.subf %218, %219 : vector<2x128xf32>
    %cst_64 = arith.constant -1.000000e+00 : f32
    %cst_65 = arith.constant 1.000000e+00 : f32
    %221 = vector.broadcast %cst_64 : f32 to vector<2x128xf32>
    %222 = arith.maximumf %221, %208 : vector<2x128xf32>
    %223 = vector.broadcast %cst_65 : f32 to vector<2x128xf32>
    %224 = arith.minimumf %223, %222 : vector<2x128xf32>
    %c0_66 = arith.constant 0 : index
    %c0_67 = arith.constant 0 : index
    %c0_68 = arith.constant 0 : index
    %c0_69 = arith.constant 0 : index
    %225 = vector.load %arg4[%c0_66, %c0_67, %c0_68, %c0_69] : memref<1x3x2x128xf32, #tpu.memory_space<vmem>>, vector<1x1x2x128xf32>
    %226 = vector.shape_cast %225 : vector<1x1x2x128xf32> to vector<2x128xf32>
    %227 = vector.shape_cast %224 : vector<2x128xf32> to vector<1x1x2x128xf32>
    tpu.vector_store %arg4[%c0_66, %c0_67, %c0_68, %c0_69], %227 {strides = array<i32>} : memref<1x3x2x128xf32, #tpu.memory_space<vmem>>, vector<1x1x2x128xf32>,
    %cst_70 = arith.constant -1.000000e+00 : f32
    %cst_71 = arith.constant 1.000000e+00 : f32
    %228 = vector.broadcast %cst_70 : f32 to vector<2x128xf32>
    %229 = arith.maximumf %228, %214 : vector<2x128xf32>
    %230 = vector.broadcast %cst_71 : f32 to vector<2x128xf32>
    %231 = arith.minimumf %230, %229 : vector<2x128xf32>
    %c0_72 = arith.constant 0 : index
    %c1_73 = arith.constant 1 : index
    %c0_74 = arith.constant 0 : index
    %c0_75 = arith.constant 0 : index
    %232 = vector.load %arg4[%c0_72, %c1_73, %c0_74, %c0_75] : memref<1x3x2x128xf32, #tpu.memory_space<vmem>>, vector<1x1x2x128xf32>
    %233 = vector.shape_cast %232 : vector<1x1x2x128xf32> to vector<2x128xf32>
    %234 = vector.shape_cast %231 : vector<2x128xf32> to vector<1x1x2x128xf32>
    tpu.vector_store %arg4[%c0_72, %c1_73, %c0_74, %c0_75], %234 {strides = array<i32>} : memref<1x3x2x128xf32, #tpu.memory_space<vmem>>, vector<1x1x2x128xf32>,
    %cst_76 = arith.constant -1.000000e+00 : f32
    %cst_77 = arith.constant 1.000000e+00 : f32
    %235 = vector.broadcast %cst_76 : f32 to vector<2x128xf32>
    %236 = arith.maximumf %235, %220 : vector<2x128xf32>
    %237 = vector.broadcast %cst_77 : f32 to vector<2x128xf32>
    %238 = arith.minimumf %237, %236 : vector<2x128xf32>
    %c0_78 = arith.constant 0 : index
    %c2_79 = arith.constant 2 : index
    %c0_80 = arith.constant 0 : index
    %c0_81 = arith.constant 0 : index
    %239 = vector.load %arg4[%c0_78, %c2_79, %c0_80, %c0_81] : memref<1x3x2x128xf32, #tpu.memory_space<vmem>>, vector<1x1x2x128xf32>
    %240 = vector.shape_cast %239 : vector<1x1x2x128xf32> to vector<2x128xf32>
    %241 = vector.shape_cast %238 : vector<2x128xf32> to vector<1x1x2x128xf32>
    tpu.vector_store %arg4[%c0_78, %c2_79, %c0_80, %c0_81], %241 {strides = array<i32>} : memref<1x3x2x128xf32, #tpu.memory_space<vmem>>, vector<1x1x2x128xf32>,
    return
  }
  func.func @transform_0(%arg0: i32, %arg1: i32) -> i32 {
    %c0_i32 = arith.constant 0 : i32
    %c0_i32_0 = arith.constant 0 : i32
    return %c0_i32 : i32
  }
  func.func @transform_1(%arg0: i32, %arg1: i32) -> (i32, i32, i32, i32) {
    %c0_i32 = arith.constant 0 : i32
    %c0_i32_0 = arith.constant 0 : i32
    %c0_i32_1 = arith.constant 0 : i32
    return %arg0, %c0_i32, %arg1, %c0_i32_0 : i32, i32, i32, i32
  }
  func.func @transform_2(%arg0: i32, %arg1: i32) -> (i32, i32, i32, i32) {
    %c0_i32 = arith.constant 0 : i32
    %c0_i32_0 = arith.constant 0 : i32
    %c0_i32_1 = arith.constant 0 : i32
    return %arg0, %c0_i32, %arg1, %c0_i32_0 : i32, i32, i32, i32
  }
}

</mosaic_0001>

<bundles_post_ra>
// kernel: tpu_custom_call.1
= control target key start
LH: loop header
LB: loop body
LE: loop exit
PB: predicated region body
PF: predicated region fallthrough
CT: control target
= control target key end

     0   :  { %7 = vsyncpa [#allocation5], 0  ;;  %s995_s0 = inlined_call_operand.hbm [shape: f32[16], index: 0, kind: input, shape index: {}]   ;;  %s996_s1 = inlined_call_operand.hbm [shape: f32[2,3,2,128], index: 1, kind: input, shape index: {}]   ;;  %s997_s2 = inlined_call_operand.hbm [shape: f32[2,3,2,128], index: 2, kind: output, shape index: {}]  }
   0x1   :  { %8 = vsyncpa [#allocation3], 0 }
   0x2   :  { %10 = vsyncpa [#allocation3 + $0x1], 0 }
   0x3   :  { %11 = vsyncpa [#allocation4], 0 }
   0x4   :  { %13 = vsyncpa [#allocation4 + $0x1], 0  ;;  %s810_s9 = smov 0   ;;  %s812_s10 = smov 0  }
   0x5   :  { %s814_s11 = smov 0   ;;  %s816_s12 = smov 0  }
   0x6   :  { %s818_s13 = smov 0   ;;  %s820_s14 = smov 0  }
   0x7 LB: > { %s542_s15 = sadd.s32 4294967295, %s786_s14   ;;  %s543_s16 = sadd.s32 4294967294, %s786_s14   ;;  %s786_s14 = sphi %s820_s14, %s19_s14   ;;  %s782_s13 = sphi %s818_s13, %s1009_s13   ;;  %s778_s12 = sphi %s816_s12, %s1008_s12   ;;  %s774_s11 = sphi %s814_s11, %s1007_s11   ;;  %s770_s10 = sphi %s812_s10, %s1006_s10   ;;  %s766_s9 = sphi %s810_s9, %s1005_s9  }
   0x8   : > { %s61_s17 = sadd.s32 1, %s774_s11  ;;  %p68_p0 = scmp.ne.s32.totalorder %s774_s11, %s770_s10 }
   0x9   : > { %p69_p1 = scmp.eq.s32.totalorder %s786_s14, 0  ;;  %p74_p2 = scmp.ne.s32.totalorder %s770_s10, %s766_s9 }
   0xa   : > { %p848_p3 = scmp.eq.s32.totalorder %s542_s15, 0  ;;  %p100_p4 = scmp.eq.s32.totalorder %s542_s15, 1 }
   0xb   : > { %p852_p5 = por %p69_p1, %p68_p0  ;;  %p106_p6 = scmp.eq.s32.totalorder %s543_s16, 1 }
   0xc   : > { %p858_p7 = por %p848_p3, %p74_p2  ;;  %p862_p8 = por %p100_p4, %p68_p0 }
   0xd   : > { %p866_p9 = por %p106_p6, %p74_p2  ;;  %p544_p10 = scmp.ge.s32.totalorder %s786_s14, 1 }
   0xe   : > { %p113_p11 = scmp.lt.s32.totalorder %s786_s14, 3  ;;  %s125_s25 = sshll.u32 %s995_s0, 4  ;;  %s126_s25 = int_to_ptr.hbm [resolvable:$true] %s125_s25 }
   0xf   : > { %p546_p13 = scmp.ge.s32.totalorder %s786_s14, 2  ;;  %p589_p0 = scmp.lt.s32.totalorder %s786_s14, 2 }
  0x10   : > { %p875_p12 = pnand %p544_p10, %p113_p11  ;;  %s31_s28 = sadd.s32 1, %s782_s13 }
  0x11   : > { %p885_p2 = pnand %p589_p0, %p852_p5  ;;  %p33_p6 = scmp.ge.s32.totalorder %s31_s28, 2 }
  0x12   : > { %p576_p1 = pneg %p875_p12  ;;  %s136_s29 = sand.u32 1, %s774_s11  }
  0x13   : > { %s788_s30 = smov [#allocation2]   ;;  %s1011_s28 = smov (%p33_p6, %s31_s28), 0 }
  0x14   : > { %p577_p4 = pnand %p576_p1, %p848_p3  ;;  %s564_s3 = smul.u32 6, %s136_s29 }
  0x15   : > { %s56_s4 = ssub.s32 %s782_s13, %s1011_s28  ;;  %s565_s5 = smul.u32 6, %s782_s13 }
  0x16   : > { %579 = dma.hbm_to_smem (!%p577_p4), %s126_s25, 16, %s788_s30, [#allocation5]  }
  0x17   : > { %p59_p10 = scmp.eq.s32.totalorder %s56_s4, 0  ;;  %s146_s8 = scalar_lea.hbm %s996_s1, %s565_s5 }
  0x18   : > { %s140_s15 = scalar_lea.vmem [#allocation6], %s564_s3  ;;  %s147_s23 = sshll.u32 %s146_s8, 4  ;;  %s148_s23 = int_to_ptr.hbm [resolvable:$true] %s147_s23 }
  0x19   : > { %s149_s16 = sshll.u32 %s140_s15, 4  ;;  %s137_s24 = scalar_lea.sflag [#allocation3], %s136_s29  ;;  %s150_s16 = int_to_ptr.vmem [resolvable:$true] %s149_s16 }
  0x1a   : > { %s904_s19 = scalar_select %p59_p10, %s774_s11, %s61_s17  }
  0x1b   : > { %s789_s25 = smov 32   ;;  %s790_s30 = smov 2  }
  0x1c   : > { %583 = dma.hbm_to_vmem [thread:$0]  (!%p885_p2), %s148_s23, 96, %s150_s16, %s137_s24, %s789_s25, %s789_s25, %s790_s30  }
  0x1d   : > { %161 = sbr.rel (%p875_p12) target bundleno = 187 (0xbb), region = 28 }
  0x22   : > { %753 = dma.done.wait (%p848_p3), [#allocation5], 16  }
  0x23   : > { %755 = vsyncadd (%p848_p3), [#allocation5], 4294967280  ;;  %s915_s17 = sand.u32 1, %s770_s10  }
  0x24   : > { %s566_s29 = smul.u32 6, %s915_s17  ;;  %s169_s3 = scalar_lea.sflag [#allocation3], %s915_s17 }
  0x26   : > { %s172_s27 = scalar_lea.vmem [#allocation6], %s566_s29 }
  0x27   : > { %757 = dma.done.wait (%p858_p7), %s169_s3, 96  }
  0x28   : > { %759 = vsyncadd (%p858_p7), %s169_s3, 4294967200 }
  0x29   : > { %178 = sfence }
  0x2a   : > { %s926_s18 = sshll.u32 %s778_s12, 3  ;;  %v205_v0 = vld [vmem:[%s172_s27] sm:$0x3]  ;;  %v551_v1 = vld [vmem:[%s172_s27 + $0x2] sm:$0x3]  ;;  %v791_v37 = vmov 1.0  }
  0x2b   : > { %s196_s26 = sld [smem:[#allocation2 + %s926_s18]]  ;;  %s197_s4 = sadd.s32 1, %s926_s18  ;;  %v552_v2 = vld [vmem:[%s172_s27 + $0x4] sm:$0x3] }
  0x2c   : > { %s198_s5 = sld [smem:[#allocation2 + %s197_s4]]  ;;  %s199_s6 = sadd.s32 2, %s926_s18 }
  0x2d   : > { %s201_s7 = sadd.s32 3, %s926_s18  ;;  %s200_s8 = sld [smem:[#allocation2 + %s199_s6]] }
  0x2e   : > { %s202_s15 = sld [smem:[#allocation2 + %s201_s7]]  ;;  %s203_s20 = sadd.s32 4, %s926_s18 }
  0x2f   : > { %s204_s16 = sld [smem:[#allocation2 + %s203_s20]]  ;;  %s567_s23 = smul.u32 6, %s778_s12 }
  0x30   : > { %s194_s3 = scalar_lea.vmem [#allocation7], %s566_s29  ;;  %s429_s18 = scalar_lea.sflag [#allocation4], %s915_s17 }
  0x31   : > { %v210_v3 = vstv %s196_s26  ;;  %s441_s30 = scalar_lea.hbm %s997_s2, %s567_s23  ;;  %s442_s27 = sshll.u32 %s194_s3, 4  ;;  %s443_s27 = int_to_ptr.vmem [resolvable:$true] %s442_s27 }
  0x32   : > { %v211_v4 = vmul.f32 %v210_v3, %v205_v0  ;;  %v212_v5 = vstv %s198_s5  ;;  %v214_v6 = vmul.f32 %v551_v1, %v210_v3  ;;  %v216_v7 = vmul.f32 %v552_v2, %v210_v3  ;;  %s444_s12 = sshll.u32 %s441_s30, 4  ;;  %s720_s6 = scalar_lea.hbm %s997_s2, 12  ;;  %s445_s12 = int_to_ptr.hbm [resolvable:$true] %s444_s12 }
  0x33   : > { %v225_v14 = vstv %s200_s8  ;;  %s714_s26 = sshra.s32 %s445_s12, 4  ;;  %s715_s26 = int_to_ptr.hbm [resolvable:$true] %s714_s26 }
  0x34   : > { %v213_v8 = vadd.f32 %v212_v5, %v211_v4  ;;  %v215_v9 = vadd.f32 %v214_v6, %v212_v5  ;;  %v217_v10 = vadd.f32 %v216_v7, %v212_v5  ;;  %v223_v16 = vstv %s202_s15  ;;  %s716_s29 = scalar_lea.hbm %s715_s26, 6  ;;  %p721_p11 = scmp.lt.s32.totalorder %s715_s26, %s997_s2 }
  0x35   : > { %p717_p3 = scmp.ne.s32.totalorder %s715_s26, %s716_s29  ;;  %p722_p12 = scmp.lt.s32.totalorder %s720_s6, %s716_s29 }
  0x36   : > { %v218_v11 = vmul.f32 0.299, %v213_v8  ;;  %v219_v12 = vmul.f32 0.587, %v215_v9  ;;  %v221_v13 = vmul.f32 0.114, %v217_v10  ;;  %v226_v18 = vmul.f32 %v225_v14, %v213_v8 }
  0x37   : > { %v228_v19 = vmul.f32 %v225_v14, %v215_v9  ;;  %v230_v20 = vmul.f32 %v225_v14, %v217_v10  ;;  %p718_p5 = pnand %p717_p3, %p862_p8  ;;  %p723_p0 = por %p722_p12, %p721_p11 }
  0x38   : > { %v220_v15 = vadd.f32 %v219_v12, %v218_v11  ;;  %v300_v12 = vstv %s204_s16 }
  0x39   : > { %p719_p7 = pneg %p718_p5 }
  0x3a   : > { %v222_v17 = vadd.f32 %v221_v13, %v220_v15  ;;  %v792_v13 = vmov 6.0  }
  0x3b   : > { %p724_p1 = pnand %p723_p0, %p719_p7 }
  0x3c   : > { %v224_v21 = vmul.f32 %v223_v16, %v222_v17 }
  0x3e   : > { %v227_v22 = vadd.f32 %v226_v18, %v224_v21  ;;  %v229_v23 = vadd.f32 %v228_v19, %v224_v21  ;;  %v231_v24 = vadd.f32 %v230_v20, %v224_v21 }
  0x40   : > { %v232_v25 = vadd.f32 1.0, %v227_v22  ;;  %v234_v26 = vadd.f32 1.0, %v229_v23  ;;  %v236_v27 = vadd.f32 1.0, %v231_v24 }
  0x42   : > { %v233_v28 = vmul.f32 0.5, %v232_v25  ;;  %v235_v29 = vmul.f32 0.5, %v234_v26  ;;  %v237_v30 = vmul.f32 0.5, %v236_v27 }
  0x44   : > { %v238_v31 = vmax.f32 %v233_v28, %v235_v29  ;;  %v240_v32 = vmin.f32 %v233_v28, %v235_v29 }
  0x46   : > { %v932_v33 = vmax.f32 %v238_v31, %v237_v30  ;;  %v241_v34 = vmin.f32 %v240_v32, %v237_v30 }
  0x48   : > { %v935_v35 = vsub.f32 %v932_v33, %v241_v34  ;;  %v263_v46 = vsub.f32 %v932_v33, %v233_v28  ;;  %v265_v48 = vsub.f32 %v932_v33, %v235_v29  ;;  %v267_v49 = vsub.f32 %v932_v33, %v237_v30 }
  0x49   : > { %vm271_vm5 = vcmp.eq.f32.partialorder %v932_v33, %v235_v29  ;;  %vm269_vm6 = vcmp.eq.f32.partialorder %v932_v33, %v233_v28 }
  0x4a   : > { %vm246_vm0 = vcmp.gt.f32.partialorder %v935_v35, 1e-06 }
  0x4b   : > { %v247_v36 = vsel %vm246_vm0, %v935_v35, 1.0 }
  0x4c   : > { %647 = vrcp.f32 %v247_v36  ;;  %v259_v40 = vand.u32 2147483648, %v247_v36  ;;  %vm253_vm1 = vweird.f32 %v247_v36  ;;  %v257_v42 = vand.u32 2147483647, %v247_v36 }
  0x4d   : > { %649 = vrcp.f32 %v791_v37 }
  0x4e   : > { %v260_v45 = vor.u32 1.1754944e-38, %v259_v40  ;;  %vm258_vm4 = vcmp.eq.f32.partialorder %v257_v42, 8.507059e+37  ;;  %651 = vrcp.f32 %v792_v13 }
  0x52   : > { %v648_v38 = vpop.eup %647 }
  0x53   : > { %v249_v39 = vmul.f32 %v648_v38, %v247_v36  ;;  %vm254_vm2 = vweird.f32 %v648_v38  ;;  %v650_v43 = vpop.eup %649 }
  0x54   : > { %vm255_vm3 = vmor %vm253_vm1, %vm254_vm2  ;;  %v281_v50 = vsub.f32 1.0, %v650_v43  ;;  %vm284_vm7 = vweird.f32 %v650_v43  ;;  %v652_v18 = vpop.eup %651 }
  0x55   : > { %v250_v41 = vsub.f32 1.0, %v249_v39  ;;  %v327_v21 = vmul.f32 6.0, %v652_v18 }
  0x56   : > { %v282_v56 = vmul.f32 %v650_v43, %v281_v50 }
  0x57   : > { %v251_v44 = vmul.f32 %v648_v38, %v250_v41  ;;  %v328_v24 = vsub.f32 1.0, %v327_v21 }
  0x58   : > { %v283_v62 = vadd.f32 %v650_v43, %v282_v56 }
  0x59   : > { %v252_v47 = vadd.f32 %v648_v38, %v251_v44  ;;  %v329_v28 = vmul.f32 %v652_v18, %v328_v24 }
  0x5a   : > { %v285_v2 = vsel %vm284_vm7, %v650_v43, %v283_v62 }
  0x5b   : > { %v256_v51 = vsel %vm255_vm3, %v648_v38, %v252_v47  ;;  %v330_v31 = vadd.f32 %v652_v18, %v329_v28  ;;  %v243_v47 = vadd.f32 1e-06, %v932_v33 }
  0x5c   : > { %v261_v52 = vsel %vm258_vm4, %v260_v45, %v256_v51 }
  0x5d   : > { %v264_v53 = vmul.f32 %v263_v46, %v261_v52  ;;  %v266_v54 = vmul.f32 %v265_v48, %v261_v52  ;;  %v268_v55 = vmul.f32 %v267_v49, %v261_v52  ;;  %653 = vrcp.f32 %v243_v47 }
  0x5f   : > { %v272_v57 = vadd.f32 2.0, %v264_v53  ;;  %v274_v58 = vadd.f32 4.0, %v266_v54  ;;  %v270_v59 = vsub.f32 %v268_v55, %v266_v54 }
  0x61   : > { %v273_v60 = vsub.f32 %v272_v57, %v268_v55  ;;  %v275_v61 = vsub.f32 %v274_v58, %v264_v53 }
  0x63   : > { %v276_v63 = vsel %vm271_vm5, %v273_v60, %v275_v61 }
  0x64   : > { %v277_v0 = vsel %vm269_vm6, %v270_v59, %v276_v63 }
  0x65   : > { %v278_v1 = vmul.f32 0.16666667, %v277_v0 }
  0x67   : > { %v279_v3 = vand.u32 2147483647, %v278_v1  ;;  %v292_v7 = vand.u32 2147483648, %v278_v1 }
  0x69   : > { %v286_v4 = vmul.f32 %v285_v2, %v279_v3 }
  0x6b   : > { %v287_v5 = vfloor.f32 %v286_v4 }
  0x6d   : > { %v288_v6 = vsub.f32 %v279_v3, %v287_v5 }
  0x6f   : > { %vm289_vm8 = vcmp.eq.f32.partialorder %v288_v6, 1.0 }
  0x70   : > { %v290_v8 = vsel %vm289_vm8, 0.0, %v288_v6 }
  0x71   : > { %v291_v9 = vand.u32 2147483647, %v290_v8 }
  0x73   : > { %v293_v10 = vor.u32 %v292_v7, %v291_v9 }
  0x75   : > { %vm294_vm9 = vcmp.ne.f32.partialorder %v293_v10, 0.0  ;;  %vm295_vm10 = vcmp.lt.f32.partialorder %v293_v10, 0.0  ;;  %v297_v11 = vadd.f32 1.0, %v293_v10 }
  0x76   : > { %vm296_vm11 = vmand %vm295_vm10, %vm294_vm9 }
  0x77   : > { %v298_v14 = vsel %vm296_vm11, %v297_v11, %v293_v10 }
  0x78   : > { %v299_v15 = vsel %vm246_vm0, %v298_v14, 0.0  ;;  %vm331_vm0 = vweird.f32 %v652_v18 }
  0x79   : > { %v301_v16 = vadd.f32 %v300_v12, %v299_v15  ;;  %v332_v38 = vsel %vm331_vm0, %v652_v18, %v330_v31 }
  0x7b   : > { %v302_v17 = vand.u32 2147483647, %v301_v16  ;;  %v315_v23 = vand.u32 2147483648, %v301_v16 }
  0x7d   : > { %v309_v19 = vmul.f32 %v302_v17, %v285_v2  ;;  %v654_v2 = vpop.eup %653 }
  0x7e   : > { %v245_v8 = vmul.f32 %v654_v2, %v935_v35 }
  0x7f   : > { %v310_v20 = vfloor.f32 %v309_v19 }
  0x80   : > { %v323_v16 = vmul.f32 %v245_v8, %v932_v33 }
  0x81   : > { %v311_v22 = vsub.f32 %v302_v17, %v310_v20 }
  0x83   : > { %vm312_vm12 = vcmp.eq.f32.partialorder %v311_v22, 1.0 }
  0x84   : > { %v313_v25 = vsel %vm312_vm12, 0.0, %v311_v22 }
  0x85   : > { %v314_v26 = vand.u32 2147483647, %v313_v25 }
  0x87   : > { %v316_v27 = vor.u32 %v315_v23, %v314_v26 }
  0x89   : > { %vm317_vm13 = vcmp.ne.f32.partialorder %v316_v27, 0.0  ;;  %vm318_vm14 = vcmp.lt.f32.partialorder %v316_v27, 0.0  ;;  %v320_v29 = vadd.f32 1.0, %v316_v27 }
  0x8a   : > { %vm319_vm15 = vmand %vm318_vm14, %vm317_vm13 }
  0x8b   : > { %v321_v30 = vsel %vm319_vm15, %v320_v29, %v316_v27 }
  0x8c   : > { %v322_v32 = vmul.f32 6.0, %v321_v30 }
  0x8e   : > { %v324_v34 = vadd.f32 5.0, %v322_v32  ;;  %v347_v36 = vadd.f32 3.0, %v322_v32  ;;  %v370_v37 = vadd.f32 1.0, %v322_v32 }
  0x90   : > { %v325_v39 = vand.u32 2147483647, %v324_v34  ;;  %v348_v40 = vand.u32 2147483647, %v347_v36  ;;  %v371_v41 = vand.u32 2147483647, %v370_v37 }
  0x91   : > { %v340_v55 = vand.u32 2147483648, %v324_v34  ;;  %v363_v56 = vand.u32 2147483648, %v347_v36  ;;  %v386_v59 = vand.u32 2147483648, %v370_v37 }
  0x92   : > { %v333_v42 = vmul.f32 %v332_v38, %v325_v39  ;;  %v356_v43 = vmul.f32 %v348_v40, %v332_v38  ;;  %v379_v44 = vmul.f32 %v371_v41, %v332_v38 }
  0x94   : > { %v334_v45 = vfloor.f32 %v333_v42  ;;  %v357_v46 = vfloor.f32 %v356_v43  ;;  %v380_v48 = vfloor.f32 %v379_v44 }
  0x96   : > { %v335_v49 = vmul.f32 6.0, %v334_v45  ;;  %v358_v50 = vmul.f32 6.0, %v357_v46  ;;  %v381_v51 = vmul.f32 6.0, %v380_v48 }
  0x98   : > { %v336_v52 = vsub.f32 %v325_v39, %v335_v49  ;;  %v359_v53 = vsub.f32 %v348_v40, %v358_v50  ;;  %v382_v54 = vsub.f32 %v371_v41, %v381_v51 }
  0x9a   : > { %vm337_vm1 = vcmp.eq.f32.partialorder %v336_v52, 6.0  ;;  %vm360_vm2 = vcmp.eq.f32.partialorder %v359_v53, 6.0  ;;  %vm383_vm3 = vcmp.eq.f32.partialorder %v382_v54, 6.0 }
  0x9b   : > { %v338_v57 = vsel %vm337_vm1, 0.0, %v336_v52  ;;  %v361_v58 = vsel %vm360_vm2, 0.0, %v359_v53  ;;  %v384_v62 = vsel %vm383_vm3, 0.0, %v382_v54 }
  0x9c   : > { %v339_v60 = vand.u32 2147483647, %v338_v57  ;;  %v362_v61 = vand.u32 2147483647, %v361_v58  ;;  %v385_v63 = vand.u32 2147483647, %v384_v62 }
  0x9e   : > { %v341_v0 = vor.u32 %v340_v55, %v339_v60  ;;  %v364_v1 = vor.u32 %v363_v56, %v362_v61  ;;  %v387_v3 = vor.u32 %v386_v59, %v385_v63 }
  0xa0   : > { %vm342_vm4 = vcmp.ne.f32.partialorder %v341_v0, 0.0  ;;  %vm343_vm5 = vcmp.lt.f32.partialorder %v341_v0, 0.0  ;;  %v345_v4 = vadd.f32 6.0, %v341_v0  ;;  %vm365_vm6 = vcmp.ne.f32.partialorder %v364_v1, 0.0 }
  0xa1   : > { %vm344_vm7 = vmand %vm343_vm5, %vm342_vm4  ;;  %vm366_vm8 = vcmp.lt.f32.partialorder %v364_v1, 0.0  ;;  %v368_v5 = vadd.f32 6.0, %v364_v1  ;;  %vm388_vm9 = vcmp.ne.f32.partialorder %v387_v3, 0.0  ;;  %vm389_vm10 = vcmp.lt.f32.partialorder %v387_v3, 0.0 }
  0xa2   : > { %v346_v6 = vsel %vm344_vm7, %v345_v4, %v341_v0  ;;  %vm367_vm11 = vmand %vm366_vm8, %vm365_vm6  ;;  %v391_v7 = vadd.f32 6.0, %v387_v3 }
  0xa3   : > { %v393_v9 = vsub.f32 4.0, %v346_v6  ;;  %v369_v10 = vsel %vm367_vm11, %v368_v5, %v364_v1  ;;  %vm390_vm12 = vmand %vm389_vm10, %vm388_vm9 }
  0xa4   : > { %v397_v11 = vsub.f32 4.0, %v369_v10  ;;  %v392_v12 = vsel %vm390_vm12, %v391_v7, %v387_v3 }
  0xa5   : > { %v394_v13 = vmin.f32 %v346_v6, %v393_v9  ;;  %v401_v14 = vsub.f32 4.0, %v392_v12 }
  0xa6   : > { %v398_v15 = vmin.f32 %v369_v10, %v397_v11 }
  0xa7   : > { %v395_v17 = vmax.f32 %v394_v13, 0.0  ;;  %v402_v18 = vmin.f32 %v392_v12, %v401_v14 }
  0xa8   : > { %v399_v19 = vmax.f32 %v398_v15, 0.0 }
  0xa9   : > { %v396_v20 = vmin.f32 %v395_v17, 1.0  ;;  %v403_v21 = vmax.f32 %v402_v18, 0.0 }
  0xaa   : > { %v400_v22 = vmin.f32 %v399_v19, 1.0 }
  0xab   : > { %v405_v35 = vmul.f32 %v396_v20, %v323_v16  ;;  %v404_v23 = vmin.f32 %v403_v21, 1.0 }
  0xac   : > { %v409_v24 = vmul.f32 %v400_v22, %v323_v16 }
  0xad   : > { %v406_v25 = vsub.f32 %v932_v33, %v405_v35  ;;  %v413_v26 = vmul.f32 %v404_v23, %v323_v16 }
  0xae   : > { %v410_v27 = vsub.f32 %v932_v33, %v409_v24 }
  0xaf   : > { %v407_v28 = vmul.f32 2.0, %v406_v25  ;;  %v414_v29 = vsub.f32 %v932_v33, %v413_v26 }
  0xb0   : > { %v411_v30 = vmul.f32 2.0, %v410_v27 }
  0xb1   : > { %v553_v31 = vadd.f32 -1.0, %v407_v28  ;;  %v415_v32 = vmul.f32 2.0, %v414_v29 }
  0xb2   : > { %v554_v34 = vadd.f32 -1.0, %v411_v30 }
  0xb3   : > { %v556_v36 = vclamps-f32 %v553_v31, 1.0  ;;  %v555_v37 = vadd.f32 -1.0, %v415_v32 }
  0xb4   : > { %v557_v38 = vclamps-f32 %v554_v34, 1.0 }
  0xb5   : > { %419 = vst [vmem:[%s194_s3] sm:$0x3] %v556_v36  ;;  %v559_v39 = vclamps-f32 %v555_v37, 1.0 }
  0xb6   : > { %558 = vst [vmem:[%s194_s3 + $0x2] sm:$0x3] %v557_v38 }
  0xb7   : > { %560 = vst [vmem:[%s194_s3 + $0x4] sm:$0x3] %v559_v39 }
  0xb8   : > { %727 = shalt.err (!%p724_p1)
}
  0xb9   : > { %s793_s17 = smov 32   ;;  %s794_s15 = smov 2  }
  0xba   : > { %574 = dma.vmem_to_hbm [thread:$0]  (%p862_p8), %s443_s27, 96, %s445_s12, %s429_s18, %s793_s17, %s793_s17, %s794_s15  }
  0xbb PF: > { %s459_s20 = sand.u32 1, %s766_s9   ;;  %p585_p2 = pnand %p546_p13, %p866_p9 }
  0xbc   : > { %s460_s16 = scalar_lea.sflag [#allocation4], %s459_s20 }
  0xbd   : > { %p586_p4 = pneg %p585_p2 }
  0xbf   : > { %761 = dma.done.wait (%p586_p4), %s460_s16, 96  }
  0xc0   : > { %763 = vsyncadd (%p586_p4), %s460_s16, 4294967200  ;;  %s19_s14 = sadd.s32 1, %s786_s14   ;;  %s1005_s9 = smov %s770_s10 }
  0xc1   : > { %p16_p6 = scmp.ge.s32.totalorder %s19_s14, 4   ;;  %s1006_s10 = smov %s774_s11 }
  0xc2   : > { %s1007_s11 = smov %s904_s19  ;;  %s1008_s12 = smov %s782_s13 }
  0xc3   : > { %s1009_s13 = smov %s1011_s28  ;;  %18 = sbr.rel (!%p16_p6) target bundleno = 7 (0x7), region = 82 }
  0xc8   :  { %466 = vsyncpa [#allocation3], 1 }
  0xc9   :  { %468 = vsyncpa [#allocation3 + $0x1], 1 }
  0xca   :  { %469 = vsyncpa [#allocation4], 1 }
  0xcb   :  { %471 = vsyncpa [#allocation4 + $0x1], 1 }
  0xcc   :  { %472 = vsyncpa [#allocation5], 1 }
  0xcd   :  { %474 = vsyncpa [#allocation5 + $0x1], 1 }

</bundles_post_ra>
